<compile_context>
chip_gen: v6e
topology: v6e:2x2x1
jax: 0.10.0
libtpu: 0.0.40
codegen_flags: <defaults>
</compile_context>

<pallas_src>
import jax
import jax.numpy as jnp
from jax.experimental import pallas as pl
from jax.experimental.pallas import tpu as pltpu


# ----------------------------------------------------------------------------
# Fused kernel:  out[:, tile] = (tanh(x @ W1 + b1) @ W2 + b2) @ basis_T[:, tile]
# ----------------------------------------------------------------------------
def bvnorm_fused_kernel(x_ref, w1_ref, b1_ref, w2_ref, b2_ref, bT_ref, o_ref):
    # Tiny BC_NET, recomputed per X-tile: keeps the X axis dependency-free ("parallel").
    h = jnp.tanh(
        jnp.dot(x_ref[...], w1_ref[...], preferred_element_type=jnp.float32)
        + b1_ref[...]
    )
    coeff = (
        jnp.dot(h, w2_ref[...], preferred_element_type=jnp.float32) + b2_ref[...]
    )
    # einsum('bm,mx->bx') on the lane-dense (M, tx) basis tile -> lane-dense (B, tx) store.
    o_ref[...] = jnp.dot(coeff, bT_ref[...], preferred_element_type=jnp.float32)


# ----------------------------------------------------------------------------
# One-time layout prep (hoisted out of the hot path; cache the result).
# ----------------------------------------------------------------------------
def prepare_basis(basis, *, use_bf16_stream=False):
    """basis (X, M) -> lane-dense basis_t (M, X). Do this ONCE and reuse it."""
    basis_t = jnp.transpose(basis)
    if use_bf16_stream:
        basis_t = basis_t.astype(jnp.bfloat16)  # halves streaming DMA bytes
    return basis_t


def _vmem_capacity_bytes():
    """Generation-aware physical VMEM; conservative (v7x, 64 MiB) fallback."""
    try:
        return int(pltpu.get_tpu_info().vmem_capacity_bytes)
    except Exception:
        return 64 * 1024 * 1024


def _choose_tx(X, M, B, basis_bytes, vmem_cap, cap_lanes=8192):
    """Largest multiple-of-128 divisor of X whose double-buffered streaming tiles
    (basis + output) fit a generation-aware budget, capped at cap_lanes."""
    if X % 128 != 0:
        # Ragged X: fall back to a single full-extent tile (legal block shape).
        return X
    # Double-buffered streaming bytes per lane of tile width.
    per_lane = 2 * (M * basis_bytes + B * 4)
    # Spend at most ~40% of physical VMEM on streaming tiles; params/headroom take the rest.
    budget = int(0.4 * vmem_cap)
    best = 128
    d = 128
    limit = min(X, cap_lanes)
    while d <= limit:
        if X % d == 0 and per_lane * d <= budget:
            best = d
        d += 128
    # Megacore (v7x) friendliness: if one tile swallows all of X but halving it still
    # leaves >= 1 MiB of basis DMA per tile, keep an even grid of 2 so both TCs work.
    if best == X and X % 256 == 0:
        half = X // 2
        if M * half * basis_bytes >= (1 << 20):
            best = half
    return best


def bvnorm_forward(x_func, basis_t, params, *, tx=None):
    """BVNORM.forward for the batched (dim==2) case with geo=None.

    x_func:  (B, F) float32
    basis_t: (M, X) float32 or bfloat16 -- pre-transposed via prepare_basis()
    params:  (w1 (F,H), b1 (1,H), w2 (H,M), b2 (1,M))
    """
    w1, b1, w2, b2 = params
    B, F = x_func.shape
    M, X = basis_t.shape
    H = w1.shape[1]
    basis_bytes = jnp.dtype(basis_t.dtype).itemsize

    vmem_cap = _vmem_capacity_bytes()
    if tx is None:
        tx = _choose_tx(X, M, B, basis_bytes, vmem_cap)
    assert X % tx == 0, "X must be divisible by tx"
    assert tx % 128 == 0 or tx == X, "tx must be a multiple of 128 (or the full X)"
    n_tiles = X // tx

    # Exact VMEM accounting (+25% headroom), clamped to physical capacity:
    #   - every input/output BlockSpec is double-buffered by the pipeline,
    #   - resident params are tiny but counted anyway.
    resident = 2 * 4 * (B * F + F * H + H + H * M + M)
    streaming = 2 * tx * (M * basis_bytes + B * 4)
    vmem_limit = int(min((resident + streaming) * 1.25 + (1 << 20),
                         vmem_cap - (2 << 20)))
    vmem_limit = max(vmem_limit, 1 << 20)

    # Memory-bound cost hint for XLA's scheduler.
    cost = pl.CostEstimate(
        flops=2 * n_tiles * B * (F * H + H * M) + 2 * B * M * X,
        transcendentals=n_tiles * B * H,
        bytes_accessed=(M * basis_bytes + B * 4) * X
        + 4 * (B * F + F * H + H + H * M + M),
    )

    out = pl.pallas_call(
        bvnorm_fused_kernel,
        out_shape=jax.ShapeDtypeStruct((B, X), jnp.float32),
        grid=(n_tiles,),
        in_specs=[
            pl.BlockSpec((B, F), lambda i: (0, 0)),   # x_func, resident
            pl.BlockSpec((F, H), lambda i: (0, 0)),   # w1, resident
            pl.BlockSpec((1, H), lambda i: (0, 0)),   # b1, resident
            pl.BlockSpec((H, M), lambda i: (0, 0)),   # w2, resident
            pl.BlockSpec((1, M), lambda i: (0, 0)),   # b2, resident
            pl.BlockSpec((M, tx), lambda i: (0, i)),  # basis_T tile (lane-dense)
        ],
        out_specs=pl.BlockSpec((B, tx), lambda i: (0, i)),  # lane-dense store
        compiler_params=pltpu.CompilerParams(
            dimension_semantics=("parallel",),
            vmem_limit_bytes=vmem_limit,
        ),
        cost_estimate=cost,
    )(x_func, w1, b1, w2, b2, basis_t)
    return out


# ----------------------------------------------------------------------------
# Reference (plain JAX) for verification.
# ----------------------------------------------------------------------------
def bvnorm_reference(x_func, basis, params):
    w1, b1, w2, b2 = params
    h = jnp.tanh(x_func @ w1 + b1)
    coeff = h @ w2 + b2
    return jnp.einsum("bm,xm->bx", coeff, basis)


if __name__ == "__main__":
    # Small, MXU/vreg-friendly shapes.
    B, F, H, M, X = 8, 32, 64, 16, 256

    key = jax.random.PRNGKey(0)
    k_x, k_b, k_w1, k_b1, k_w2, k_b2 = jax.random.split(key, 6)

    x_func = jax.random.normal(k_x, (B, F), dtype=jnp.float32)
    basis = jax.random.normal(k_b, (X, M), dtype=jnp.float32)

    # Deterministic synthetic BC_NET parameters (Linear(F,H) -> tanh -> Linear(H,M)).
    params = (
        0.1 * jax.random.normal(k_w1, (F, H), dtype=jnp.float32),
        0.1 * jax.random.normal(k_b1, (1, H), dtype=jnp.float32),
        0.1 * jax.random.normal(k_w2, (H, M), dtype=jnp.float32),
        0.1 * jax.random.normal(k_b2, (1, M), dtype=jnp.float32),
    )

    # One-time layout prep (kept f32: bf16 streaming would break the 1e-4 tolerance).
    basis_t = prepare_basis(basis, use_bf16_stream=False)

    # Auto-tuned tx: for X=256 this collapses to a single full-width tile (no grid
    # overhead); on large X it grows toward the VMEM-budgeted / 8192-lane cap.
    out = bvnorm_forward(x_func, basis_t, params)
    out = jax.block_until_ready(out)

    ref = bvnorm_reference(x_func, basis, params)
    assert out.shape == (B, X)
    assert jnp.allclose(out, ref, atol=1e-4, rtol=1e-4)

    print("KERNEL_OK")
</pallas_src>

<mosaic_0001>
module attributes {stable_mosaic.version = 11 : i64} {
  func.func @bvnorm_fused_kernel(%arg0: i32, %arg1: memref<8x32xf32, #tpu.memory_space<vmem>>, %arg2: memref<32x64xf32, #tpu.memory_space<vmem>>, %arg3: memref<1x64xf32, #tpu.memory_space<vmem>>, %arg4: memref<64x16xf32, #tpu.memory_space<vmem>>, %arg5: memref<1x16xf32, #tpu.memory_space<vmem>>, %arg6: memref<16x256xf32, #tpu.memory_space<vmem>>, %arg7: memref<8x256xf32, #tpu.memory_space<vmem>>) attributes {dimension_semantics = [#tpu.dimension_semantics<parallel>], iteration_bounds = array<i64: 1>, scalar_prefetch = 0 : i64, scratch_operands = 0 : i64, tpu.core_type = #tpu.core_type<tc>, window_params = [{pipeline_mode = #tpu.pipeline_mode<synchronous>, transform_indices = @transform_0, window_bounds = array<i64: 8, 32>}, {pipeline_mode = #tpu.pipeline_mode<synchronous>, transform_indices = @transform_1, window_bounds = array<i64: 32, 64>}, {pipeline_mode = #tpu.pipeline_mode<synchronous>, transform_indices = @transform_2, window_bounds = array<i64: 1, 64>}, {pipeline_mode = #tpu.pipeline_mode<synchronous>, transform_indices = @transform_3, window_bounds = array<i64: 64, 16>}, {pipeline_mode = #tpu.pipeline_mode<synchronous>, transform_indices = @transform_4, window_bounds = array<i64: 1, 16>}, {transform_indices = @transform_5, window_bounds = array<i64: 16, 256>}, {transform_indices = @transform_6, window_bounds = array<i64: 8, 256>}]} {
    %c0 = arith.constant 0 : index
    %c0_0 = arith.constant 0 : index
    %0 = vector.load %arg1[%c0, %c0_0] : memref<8x32xf32, #tpu.memory_space<vmem>>, vector<8x32xf32>
    %c0_1 = arith.constant 0 : index
    %c0_2 = arith.constant 0 : index
    %1 = vector.load %arg2[%c0_1, %c0_2] : memref<32x64xf32, #tpu.memory_space<vmem>>, vector<32x64xf32>
    %cst = arith.constant dense<0.000000e+00> : vector<8x64xf32>
    %2 = tpu.matmul %0, %1, %cst {dimension_numbers = #tpu.dot_dimension_numbers<[1], [0], [0], [1], [0, 0, 1, 1], [], []>} : vector<8x32xf32>, vector<32x64xf32>, vector<8x64xf32> -> vector<8x64xf32>
    %c0_3 = arith.constant 0 : index
    %c0_4 = arith.constant 0 : index
    %3 = vector.load %arg3[%c0_3, %c0_4] : memref<1x64xf32, #tpu.memory_space<vmem>>, vector<1x64xf32>
    %4 = vector.broadcast %3 : vector<1x64xf32> to vector<8x64xf32>
    %5 = arith.addf %2, %4 : vector<8x64xf32>
    %6 = math.tanh %5 : vector<8x64xf32>
    %c0_5 = arith.constant 0 : index
    %c0_6 = arith.constant 0 : index
    %7 = vector.load %arg4[%c0_5, %c0_6] : memref<64x16xf32, #tpu.memory_space<vmem>>, vector<64x16xf32>
    %cst_7 = arith.constant dense<0.000000e+00> : vector<8x16xf32>
    %8 = tpu.matmul %6, %7, %cst_7 {dimension_numbers = #tpu.dot_dimension_numbers<[1], [0], [0], [1], [0, 0, 1, 1], [], []>} : vector<8x64xf32>, vector<64x16xf32>, vector<8x16xf32> -> vector<8x16xf32>
    %c0_8 = arith.constant 0 : index
    %c0_9 = arith.constant 0 : index
    %9 = vector.load %arg5[%c0_8, %c0_9] : memref<1x16xf32, #tpu.memory_space<vmem>>, vector<1x16xf32>
    %10 = vector.broadcast %9 : vector<1x16xf32> to vector<8x16xf32>
    %11 = arith.addf %8, %10 : vector<8x16xf32>
    %c0_10 = arith.constant 0 : index
    %c0_11 = arith.constant 0 : index
    %12 = vector.load %arg6[%c0_10, %c0_11] : memref<16x256xf32, #tpu.memory_space<vmem>>, vector<16x256xf32>
    %cst_12 = arith.constant dense<0.000000e+00> : vector<8x256xf32>
    %13 = tpu.matmul %11, %12, %cst_12 {dimension_numbers = #tpu.dot_dimension_numbers<[1], [0], [0], [1], [0, 0, 1, 1], [], []>} : vector<8x16xf32>, vector<16x256xf32>, vector<8x256xf32> -> vector<8x256xf32>
    %c0_13 = arith.constant 0 : index
    %c0_14 = arith.constant 0 : index
    %14 = vector.load %arg7[%c0_13, %c0_14] : memref<8x256xf32, #tpu.memory_space<vmem>>, vector<8x256xf32>
    tpu.vector_store %arg7[%c0_13, %c0_14], %13 {strides = array<i32>} : memref<8x256xf32, #tpu.memory_space<vmem>>, vector<8x256xf32>,
    return
  }
  func.func @transform_0(%arg0: i32) -> (i32, i32) {
    %c0_i32 = arith.constant 0 : i32
    %c0_i32_0 = arith.constant 0 : i32
    %c0_i32_1 = arith.constant 0 : i32
    return %c0_i32, %c0_i32_0 : i32, i32
  }
  func.func @transform_1(%arg0: i32) -> (i32, i32) {
    %c0_i32 = arith.constant 0 : i32
    %c0_i32_0 = arith.constant 0 : i32
    %c0_i32_1 = arith.constant 0 : i32
    return %c0_i32, %c0_i32_0 : i32, i32
  }
  func.func @transform_2(%arg0: i32) -> (i32, i32) {
    %c0_i32 = arith.constant 0 : i32
    %c0_i32_0 = arith.constant 0 : i32
    %c0_i32_1 = arith.constant 0 : i32
    return %c0_i32, %c0_i32_0 : i32, i32
  }
  func.func @transform_3(%arg0: i32) -> (i32, i32) {
    %c0_i32 = arith.constant 0 : i32
    %c0_i32_0 = arith.constant 0 : i32
    %c0_i32_1 = arith.constant 0 : i32
    return %c0_i32, %c0_i32_0 : i32, i32
  }
  func.func @transform_4(%arg0: i32) -> (i32, i32) {
    %c0_i32 = arith.constant 0 : i32
    %c0_i32_0 = arith.constant 0 : i32
    %c0_i32_1 = arith.constant 0 : i32
    return %c0_i32, %c0_i32_0 : i32, i32
  }
  func.func @transform_5(%arg0: i32) -> (i32, i32) {
    %c0_i32 = arith.constant 0 : i32
    %c0_i32_0 = arith.constant 0 : i32
    return %c0_i32, %arg0 : i32, i32
  }
  func.func @transform_6(%arg0: i32) -> (i32, i32) {
    %c0_i32 = arith.constant 0 : i32
    %c0_i32_0 = arith.constant 0 : i32
    return %c0_i32, %arg0 : i32, i32
  }
}

</mosaic_0001>

<bundles_post_ra>
// kernel: tpu_custom_call.1
= control target key start
LH: loop header
LB: loop body
LE: loop exit
PB: predicated region body
PF: predicated region fallthrough
CT: control target
= control target key end

     0   :  { %v371_v1 = vmov 0.0   ;;  %vm372_vm0 = vmmov 0   ;;  %s469_s0 = inlined_call_operand.vmem [shape: f32[8,32], index: 0, kind: input, shape index: {}]   ;;  %s470_s1 = inlined_call_operand.vmem [shape: f32[32,64], index: 1, kind: input, shape index: {}]   ;;  %s471_s2 = inlined_call_operand.vmem [shape: f32[1,64], index: 2, kind: input, shape index: {}]   ;;  %s472_s3 = inlined_call_operand.vmem [shape: f32[64,16], index: 3, kind: input, shape index: {}]   ;;  %s473_s4 = inlined_call_operand.vmem [shape: f32[1,16], index: 4, kind: input, shape index: {}]   ;;  %s474_s5 = inlined_call_operand.vmem [shape: f32[16,256], index: 5, kind: input, shape index: {}]   ;;  %s475_s6 = inlined_call_operand.hbm [shape: f32[8,256], index: 6, kind: output, shape index: {}]  }
   0x1   :  { %v28_v0 = vld [vmem:[%s470_s1 + $0x18] sm:$0xff]  ;;  %314 = vmatprep.subr.mxu0 %v371_v1  ;;  %v27_v2 = vld [vmem:[%s470_s1 + $0x10] sm:$0xff]  ;;  %322 = vmatprep.mubr.msk.f32.mxu0 %vm372_vm0, %v371_v1 }
   0x2   :  { %315 = vmatpush3.msra.mxu0 %v28_v0  ;;  %325 = vmatprep.subr.mxu1 %v371_v1 }
   0x3   :  { %11 = vsyncpa [#allocation3], 0  ;;  %316 = vmatprep.subr.mxu0 %v371_v1  ;;  %v26_v3 = vld [vmem:[%s470_s1 + $0x8] sm:$0xff]  ;;  %341 = vmatprep.mubr.msk.f32.mxu1 %vm372_vm0, %v371_v1  ;;  %v25_v4 = vld [vmem:[%s470_s1] sm:$0xff]  ;;  %vm36_vm1 = vcmask 261120   ;;  %vm126_vm2 = vcmask 523264  }
   0x4   :  { %317 = vmatpush3.msra.mxu0 %v27_v2  ;;  %v24_v5 = vld [vmem:[%s469_s0] sm:$0xff]  ;;  %v118_v6 = vld [vmem:[%s472_s3 + $0x38] sm:$0xff]  ;;  %v117_v7 = vld [vmem:[%s472_s3 + $0x30] sm:$0xff]  ;;  %vm204_vm3 = vcmask 130048  }
   0x5   :  { %318 = vmatprep.subr.mxu0 %v371_v1  ;;  %326 = vmatpush3.msra.mxu1 %v118_v6  ;;  %v116_v8 = vld [vmem:[%s472_s3 + $0x28] sm:$0xff]  ;;  %v115_v9 = vld [vmem:[%s472_s3 + $0x20] sm:$0xff]  ;;  %v114_v10 = vld [vmem:[%s472_s3 + $0x18] sm:$0xff] }
   0x6   :  { %319 = vmatpush3.msra.mxu0 %v26_v3  ;;  %327 = vmatprep.subr.mxu1 %v371_v1  ;;  %v113_v11 = vld [vmem:[%s472_s3 + $0x10] sm:$0xff]  ;;  %v112_v12 = vld [vmem:[%s472_s3 + $0x8] sm:$0xff]  ;;  %v111_v13 = vld [vmem:[%s472_s3] sm:$0xff] }
   0x7   :  { %320 = vmatprep.subr.mxu0 %v371_v1  ;;  %328 = vmatpush3.msra.mxu1 %v117_v7  ;;  %v203_v14 = vld [vmem:[%s474_s5 + $0x18] sm:$0xff]  ;;  %v202_v15 = vld [vmem:[%s474_s5 + $0x10] sm:$0xff]  ;;  %v295_v16 = vld [vmem:[%s471_s2] ss:$0 sm:$0xff]  ;;  %s373_s2 = smov [#allocation2]  }
   0x8   :  { %321 = vmatpush3.msra.mxu0 %v25_v4  ;;  %329 = vmatprep.subr.mxu1 %v371_v1  ;;  %v201_v21 = vld [vmem:[%s474_s5 + $0x8] sm:$0xff]  ;;  %v200_v22 = vld [vmem:[%s474_s5] sm:$0xff]  ;;  %s287_s8 = sshll.u32 %s373_s2, 4  ;;  %s288_s8 = int_to_ptr.vmem [resolvable:$true] %s287_s8 }
   0x9   :  { %323 = vmatmul.mubr.msk.f32.vlgmr.msra.gmra.mxu0 %vm36_vm1, %v24_v5  ;;  %330 = vmatpush3.msra.mxu1 %v116_v8  ;;  %v297_v23 = vld [vmem:[%s473_s4] ss:$0 sm:$0xff]  ;;  %s349_s9 = scalar_lea.vmem %s288_s8, 256  ;;  %p354_p1 = scmp.lt.s32.totalorder %s288_s8, %s288_s8 }
   0xa   :  { %272 = vmatprep.mubr.f32.mxu0 %v371_v1  ;;  %331 = vmatprep.subr.mxu1 %v371_v1  ;;  %p350_p0 = scmp.ne.s32.totalorder %s288_s8, %s349_s9  ;;  %p355_p2 = scmp.lt.s32.totalorder %s349_s9, %s349_s9 }
   0xb   :  { %332 = vmatpush3.msra.mxu1 %v115_v9  ;;  %236 = vmatprep.subr.mxu0 %v203_v14 }
   0xc   :  { %333 = vmatprep.subr.mxu1 %v371_v1  ;;  %237 = vmatpush1.msra.mxu0 %v202_v15  ;;  %p356_p3 = por %p355_p2, %p354_p1 }
   0xd   :  { %334 = vmatpush3.msra.mxu1 %v114_v10  ;;  %238 = vmatprep.subr.mxu0 %v201_v21 }
   0xe   :  { %335 = vmatprep.subr.mxu1 %v371_v1  ;;  %239 = vmatpush1.msra.mxu0 %v200_v22  ;;  %p357_p4 = pnand %p356_p3, %p350_p0 }
   0xf   :  { %336 = vmatpush3.msra.mxu1 %v113_v11 }
  0x10   :  { %337 = vmatprep.subr.mxu1 %v371_v1 }
  0x11   :  { %338 = vmatpush3.msra.mxu1 %v112_v12 }
  0x12   :  { %339 = vmatprep.subr.mxu1 %v371_v1 }
  0x13   :  { %340 = vmatpush3.msra.mxu1 %v111_v13 }
  0xc9   :  { %v106_v17 = vpop.f32.mrf.mxu0 }
  0xca   :  { %v107_v18 = vadd.f32 %v295_v16, %v106_v17 }
  0xcb   :  { %v324_v19 = vpop.f32.mrf.mxu0 }
  0xcc   :  { %347 = vtanh.f32 %v107_v18 }
  0xd9   :  { %v348_v20 = vpop.eup %347 }
  0xda   :  { %342 = vmatmul.mubr.msk.f32.vlgmr.msra.gmra.mxu1 %vm126_vm2, %v348_v20 }
 0x19a   :  { %v196_v24 = vpop.f32.mrf.mxu1 }
 0x19b   :  { %v197_v25 = vadd.f32 %v297_v23, %v196_v24 }
 0x19c   :  { %v343_v26 = vpop.f32.mrf.mxu1 }
 0x19d   :  { %299 = vmatmul.mubr.msk.f32.vlgmr.msra.gmra.mxu0 %vm204_vm3, %v197_v25 }
 0x25d   :  { %v274_v27 = vpop.f32.mrf.mxu0 }
 0x25e   :  { %279 = vst [vmem:[#allocation2] sm:$0xff] %v274_v27 }
 0x25f   :  { %v276_v28 = vpop.f32.mrf.mxu0 }
 0x260   :  { %280 = vst [vmem:[#allocation2 + $0x8] sm:$0xff] %v276_v28 }
 0x261   :  { %360 = shalt.err (!%p357_p4)
}
 0x262   :  { %290 = dma.vmem_to_hbm [thread:$0]  %s288_s8, 256, %s475_s6, [#allocation3]  }
 0x263   :  { %369 = dma.done.wait [#allocation3], 256  }
 0x264   :  { %370 = vsyncadd [#allocation3], 4294967040 }
 0x265   :  { %294 = vsyncpa [#allocation3], 1 }

</bundles_post_ra>
